<compile_context>
chip_gen: v7x
topology: tpu7x:2x2x1
jax: 0.10.0
libtpu: 0.0.40
codegen_flags: <defaults>
</compile_context>

<pallas_src>
import functools

import jax
import jax.numpy as jnp
from jax.experimental import pallas as pl
from jax.experimental.pallas import tpu as pltpu

INPUT_SIZE = 28 * 28    # 784
HIDDEN_SIZE = 500
NUM_CLASSES = 10

HIDDEN_PAD = 512        # 500 -> 512 (multiple of 128)
OUT_PAD = 128           # 10  -> 128 (lane-dense output stores)


def mlp_kernel(x_ref, w1_ref, b1_ref, w2_ref, b2_ref, o_ref):
    # Layer 1: x @ W1 (bf16 MXU, f32 accumulate), f32 bias-add + ReLU.
    h = jnp.dot(x_ref[...], w1_ref[...], preferred_element_type=jnp.float32)
    h = jnp.maximum(h + b1_ref[...], 0.0)              # b1_ref is (1, HIDDEN_PAD)
    # Layer 2: h @ W2 (bf16 MXU, f32 accumulate), f32 bias-add.
    out = jnp.dot(h.astype(jnp.bfloat16), w2_ref[...],
                  preferred_element_type=jnp.float32)
    o_ref[...] = (out + b2_ref[...]).astype(o_ref.dtype)


def prepare_params(w1, b1, w2, b2, compute_dtype=jnp.bfloat16):
    """One-time param prep (do NOT call per forward): transpose, pad, cast.

    w1: [500, 784], b1: [500], w2: [10, 500], b2: [10]  (PyTorch nn.Linear layout)
    ->  w1_t: [784, 512] bf16, b1_r: [1, 512] f32,
        w2_t: [512, 128] bf16, b2_r: [1, 128] f32
    Padded rows/cols are zero, so they contribute nothing to the result.
    """
    w1_t = jnp.zeros((INPUT_SIZE, HIDDEN_PAD), compute_dtype)
    w1_t = w1_t.at[:, :HIDDEN_SIZE].set(w1.T.astype(compute_dtype))
    b1_r = jnp.zeros((1, HIDDEN_PAD), jnp.float32).at[:, :HIDDEN_SIZE].set(b1)
    w2_t = jnp.zeros((HIDDEN_PAD, OUT_PAD), compute_dtype)
    w2_t = w2_t.at[:HIDDEN_SIZE, :NUM_CLASSES].set(w2.T.astype(compute_dtype))
    b2_r = jnp.zeros((1, OUT_PAD), jnp.float32).at[:, :NUM_CLASSES].set(b2)
    return w1_t, b1_r, w2_t, b2_r


@functools.partial(jax.jit, static_argnames=("tile_b",))
def neural_net_forward(x, w1_t, b1_r, w2_t, b2_r, *, tile_b=256):
    """x: [B, 784]; params from prepare_params(). Returns [B, 10] f32 logits."""
    B = x.shape[0]
    # Don't over-tile tiny batches; keep the batch tile a multiple of 8 sublanes.
    tb = min(tile_b, max(8, ((B + 7) // 8) * 8))
    Bp = pl.cdiv(B, tb) * tb
    if Bp != B:
        x = jnp.pad(x, ((0, Bp - B), (0, 0)))
    x = x.astype(jnp.bfloat16)
    n_tiles = Bp // tb

    bytes_accessed = (
        x.size * 2                      # bf16 activations in
        + w1_t.size * 2 + w2_t.size * 2 # bf16 weights (resident, read once)
        + b1_r.size * 4 + b2_r.size * 4
        + Bp * OUT_PAD * 4              # f32 output
    )
    cost = pl.CostEstimate(
        flops=2 * Bp * (INPUT_SIZE * HIDDEN_PAD + HIDDEN_PAD * OUT_PAD),
        transcendentals=0,
        bytes_accessed=bytes_accessed,
    )

    out_padded = pl.pallas_call(
        mlp_kernel,
        out_shape=jax.ShapeDtypeStruct((Bp, OUT_PAD), jnp.float32),
        grid=(n_tiles,),
        in_specs=[
            pl.BlockSpec((tb, INPUT_SIZE), lambda i: (i, 0)),        # x tile
            pl.BlockSpec(w1_t.shape, lambda i: (0, 0)),              # resident W1
            pl.BlockSpec(b1_r.shape, lambda i: (0, 0)),              # resident b1
            pl.BlockSpec(w2_t.shape, lambda i: (0, 0)),              # resident W2
            pl.BlockSpec(b2_r.shape, lambda i: (0, 0)),              # resident b2
        ],
        out_specs=pl.BlockSpec((tb, OUT_PAD), lambda i: (i, 0)),
        compiler_params=pltpu.CompilerParams(
            dimension_semantics=("parallel",),                       # megacore on v7x
        ),
        cost_estimate=cost,
    )(x, w1_t, b1_r, w2_t, b2_r)

    return out_padded[:B, :NUM_CLASSES]


def init_params(key):
    """PyTorch nn.Linear default init: U[-1/sqrt(fan_in), +1/sqrt(fan_in)]."""
    k1, k2, k3, k4 = jax.random.split(key, 4)
    bound1 = 1.0 / jnp.sqrt(INPUT_SIZE)
    bound2 = 1.0 / jnp.sqrt(HIDDEN_SIZE)
    w1 = jax.random.uniform(k1, (HIDDEN_SIZE, INPUT_SIZE), jnp.float32, -bound1, bound1)
    b1 = jax.random.uniform(k2, (HIDDEN_SIZE,), jnp.float32, -bound1, bound1)
    w2 = jax.random.uniform(k3, (NUM_CLASSES, HIDDEN_SIZE), jnp.float32, -bound2, bound2)
    b2 = jax.random.uniform(k4, (NUM_CLASSES,), jnp.float32, -bound2, bound2)
    return w1, b1, w2, b2


if __name__ == "__main__":
    key = jax.random.PRNGKey(0)
    kx, kp = jax.random.split(key)

    batch = 8
    x = jax.random.normal(kx, (batch, INPUT_SIZE), jnp.float32)
    w1, b1, w2, b2 = init_params(kp)

    # One-time param preparation (outside the per-call path).
    w1_t, b1_r, w2_t, b2_r = prepare_params(w1, b1, w2, b2)

    out = neural_net_forward(x, w1_t, b1_r, w2_t, b2_r)
    out = jax.block_until_ready(out)

    # Reference in plain JAX, mirroring the kernel's bf16 quantization of
    # activations/weights (accumulation stays f32).
    xb = x.astype(jnp.bfloat16).astype(jnp.float32)
    w1b = w1.astype(jnp.bfloat16).astype(jnp.float32)
    w2b = w2.astype(jnp.bfloat16).astype(jnp.float32)
    h = jnp.maximum(xb @ w1b.T + b1, 0.0)
    ref = h.astype(jnp.bfloat16).astype(jnp.float32) @ w2b.T + b2

    assert out.shape == (batch, NUM_CLASSES)
    assert jnp.allclose(out, ref, atol=1e-2, rtol=1e-2), (
        float(jnp.max(jnp.abs(out - ref))))

    print("KERNEL_OK")
</pallas_src>

<mosaic_0001>
module attributes {stable_mosaic.version = 11 : i64} {
  func.func @mlp_kernel(%arg0: i32, %arg1: memref<8x784xbf16, #tpu.memory_space<vmem>>, %arg2: memref<784x512xbf16, #tpu.memory_space<vmem>>, %arg3: memref<1x512xf32, #tpu.memory_space<vmem>>, %arg4: memref<512x128xbf16, #tpu.memory_space<vmem>>, %arg5: memref<1x128xf32, #tpu.memory_space<vmem>>, %arg6: memref<8x128xf32, #tpu.memory_space<vmem>>) attributes {dimension_semantics = [#tpu.dimension_semantics<parallel>], iteration_bounds = array<i64: 1>, scalar_prefetch = 0 : i64, scratch_operands = 0 : i64, tpu.core_type = #tpu.core_type<tc>, window_params = [{transform_indices = @transform_0, window_bounds = array<i64: 8, 784>}, {pipeline_mode = #tpu.pipeline_mode<synchronous>, transform_indices = @transform_1, window_bounds = array<i64: 784, 512>}, {pipeline_mode = #tpu.pipeline_mode<synchronous>, transform_indices = @transform_2, window_bounds = array<i64: 1, 512>}, {pipeline_mode = #tpu.pipeline_mode<synchronous>, transform_indices = @transform_3, window_bounds = array<i64: 512, 128>}, {pipeline_mode = #tpu.pipeline_mode<synchronous>, transform_indices = @transform_4, window_bounds = array<i64: 1, 128>}, {transform_indices = @transform_5, window_bounds = array<i64: 8, 128>}]} {
    %c0 = arith.constant 0 : index
    %c0_0 = arith.constant 0 : index
    %0 = vector.load %arg1[%c0, %c0_0] : memref<8x784xbf16, #tpu.memory_space<vmem>>, vector<8x784xbf16>
    %c0_1 = arith.constant 0 : index
    %c0_2 = arith.constant 0 : index
    %1 = vector.load %arg2[%c0_1, %c0_2] : memref<784x512xbf16, #tpu.memory_space<vmem>>, vector<784x512xbf16>
    %cst = arith.constant dense<0.000000e+00> : vector<8x512xf32>
    %2 = tpu.matmul %0, %1, %cst {dimension_numbers = #tpu.dot_dimension_numbers<[1], [0], [0], [1], [0, 0, 1, 1], [], []>} : vector<8x784xbf16>, vector<784x512xbf16>, vector<8x512xf32> -> vector<8x512xf32>
    %c0_3 = arith.constant 0 : index
    %c0_4 = arith.constant 0 : index
    %3 = vector.load %arg3[%c0_3, %c0_4] : memref<1x512xf32, #tpu.memory_space<vmem>>, vector<1x512xf32>
    %4 = vector.broadcast %3 : vector<1x512xf32> to vector<8x512xf32>
    %5 = arith.addf %2, %4 : vector<8x512xf32>
    %cst_5 = arith.constant 0.000000e+00 : f32
    %6 = vector.broadcast %cst_5 : f32 to vector<8x512xf32>
    %7 = arith.maximumf %5, %6 : vector<8x512xf32>
    %8 = arith.truncf %7 : vector<8x512xf32> to vector<8x512xbf16>
    %c0_6 = arith.constant 0 : index
    %c0_7 = arith.constant 0 : index
    %9 = vector.load %arg4[%c0_6, %c0_7] : memref<512x128xbf16, #tpu.memory_space<vmem>>, vector<512x128xbf16>
    %cst_8 = arith.constant dense<0.000000e+00> : vector<8x128xf32>
    %10 = tpu.matmul %8, %9, %cst_8 {dimension_numbers = #tpu.dot_dimension_numbers<[1], [0], [0], [1], [0, 0, 1, 1], [], []>} : vector<8x512xbf16>, vector<512x128xbf16>, vector<8x128xf32> -> vector<8x128xf32>
    %c0_9 = arith.constant 0 : index
    %c0_10 = arith.constant 0 : index
    %11 = vector.load %arg5[%c0_9, %c0_10] : memref<1x128xf32, #tpu.memory_space<vmem>>, vector<1x128xf32>
    %12 = vector.broadcast %11 : vector<1x128xf32> to vector<8x128xf32>
    %13 = arith.addf %10, %12 : vector<8x128xf32>
    %c0_11 = arith.constant 0 : index
    %c0_12 = arith.constant 0 : index
    %14 = vector.load %arg6[%c0_11, %c0_12] : memref<8x128xf32, #tpu.memory_space<vmem>>, vector<8x128xf32>
    tpu.vector_store %arg6[%c0_11, %c0_12], %13 {strides = array<i32>} : memref<8x128xf32, #tpu.memory_space<vmem>>, vector<8x128xf32>,
    return
  }
  func.func @transform_0(%arg0: i32) -> (i32, i32) {
    %c0_i32 = arith.constant 0 : i32
    %c0_i32_0 = arith.constant 0 : i32
    return %arg0, %c0_i32 : i32, i32
  }
  func.func @transform_1(%arg0: i32) -> (i32, i32) {
    %c0_i32 = arith.constant 0 : i32
    %c0_i32_0 = arith.constant 0 : i32
    %c0_i32_1 = arith.constant 0 : i32
    return %c0_i32, %c0_i32_0 : i32, i32
  }
  func.func @transform_2(%arg0: i32) -> (i32, i32) {
    %c0_i32 = arith.constant 0 : i32
    %c0_i32_0 = arith.constant 0 : i32
    %c0_i32_1 = arith.constant 0 : i32
    return %c0_i32, %c0_i32_0 : i32, i32
  }
  func.func @transform_3(%arg0: i32) -> (i32, i32) {
    %c0_i32 = arith.constant 0 : i32
    %c0_i32_0 = arith.constant 0 : i32
    %c0_i32_1 = arith.constant 0 : i32
    return %c0_i32, %c0_i32_0 : i32, i32
  }
  func.func @transform_4(%arg0: i32) -> (i32, i32) {
    %c0_i32 = arith.constant 0 : i32
    %c0_i32_0 = arith.constant 0 : i32
    %c0_i32_1 = arith.constant 0 : i32
    return %c0_i32, %c0_i32_0 : i32, i32
  }
  func.func @transform_5(%arg0: i32) -> (i32, i32) {
    %c0_i32 = arith.constant 0 : i32
    %c0_i32_0 = arith.constant 0 : i32
    return %arg0, %c0_i32 : i32, i32
  }
}

</mosaic_0001>

<bundles_post_ra>
// kernel: neural_net_forward.1
= control target key start
LH: loop header
LB: loop body
LE: loop exit
PB: predicated region body
PF: predicated region fallthrough
CT: control target
= control target key end

     0   :  { %10 = vsyncpa [#allocation3], 0  ;;  %s2803_s0 = inlined_call_operand.vmem [shape: bf16[8,784], index: 0, kind: input, shape index: {}]   ;;  %s2804_s1 = inlined_call_operand.hbm [shape: bf16[784,512], index: 1, kind: input, shape index: {}]   ;;  %s2805_s2 = inlined_call_operand.vmem [shape: f32[1,512], index: 2, kind: input, shape index: {}]   ;;  %s2806_s3 = inlined_call_operand.hbm [shape: bf16[512,128], index: 3, kind: input, shape index: {}]   ;;  %s2807_s4 = inlined_call_operand.vmem [shape: f32[1,128], index: 4, kind: input, shape index: {}]   ;;  %s2808_s5 = inlined_call_operand.hbm [shape: f32[8,128], index: 5, kind: output, shape index: {}]  }
   0x1   :  { %11 = vsyncpa [#allocation6], 0 }
   0x2   :  { %12 = vsyncpa [#allocation4], 0  ;;  %s2699_s18 = smov [#allocation2]   ;;  %s2627_s22 = scalar_lea.hbm %s2804_s1, 25088 }
   0x3   :  { %s20_s19 = sshll.u32 %s2699_s18, 4  ;;  %p2628_p0 = scmp.ne.s32.totalorder %s2804_s1, %s2627_s22  ;;  %s21_s19 = int_to_ptr.vmem [resolvable:$true] %s20_s19 }
   0x4   :  { %p2631_p1 = scmp.lt.u32.totalorder %s2627_s22, %s2804_s1 }
   0x6   :  { %p2633_p2 = pnand %p2631_p1, %p2628_p0 }
   0x8   :  { %2636 = shalt.err (!%p2633_p2)
}
   0x9   :  { %s2637_s27 = scalar_lea.vmem %s21_s19, 25088  ;;  %p2642_p4 = scmp.lt.s32.totalorder %s21_s19, %s21_s19 }
   0xa   :  { %p2638_p3 = scmp.ne.s32.totalorder %s21_s19, %s2637_s27  ;;  %p2643_p5 = scmp.lt.s32.totalorder %s2637_s27, %s2637_s27 }
   0xc   :  { %p2644_p6 = por %p2643_p5, %p2642_p4 }
   0xe   :  { %p2645_p7 = pnand %p2644_p6, %p2638_p3 }
  0x10   :  { %2648 = shalt.err (!%p2645_p7)
}
  0x11   :  { %s2700_s28 = smov 256   ;;  %s2701_s29 = smov 16  }
  0x12   :  { %26 = dma.hbm_to_vmem [thread:$0]  %s2804_s1, 25088, %s21_s19, [#allocation3], %s2700_s28, %s2700_s28, %s2701_s29  }
  0x13   :  { %s2702_s7 = smov [#allocation5]   ;;  %s2649_s11 = scalar_lea.hbm %s2806_s3, 4096 }
  0x14   :  { %s34_s8 = sshll.u32 %s2702_s7, 4  ;;  %p2650_p8 = scmp.ne.s32.totalorder %s2806_s3, %s2649_s11  ;;  %s35_s8 = int_to_ptr.vmem [resolvable:$true] %s34_s8 }
  0x15   :  { %p2653_p9 = scmp.lt.u32.totalorder %s2649_s11, %s2806_s3 }
  0x17   :  { %p2655_p10 = pnand %p2653_p9, %p2650_p8 }
  0x19   :  { %2658 = shalt.err (!%p2655_p10)
}
  0x1a   :  { %s2659_s16 = scalar_lea.vmem %s35_s8, 4096  ;;  %p2664_p12 = scmp.lt.s32.totalorder %s35_s8, %s35_s8 }
  0x1b   :  { %p2660_p11 = scmp.ne.s32.totalorder %s35_s8, %s2659_s16  ;;  %p2665_p13 = scmp.lt.s32.totalorder %s2659_s16, %s2659_s16 }
  0x1d   :  { %p2666_p0 = por %p2665_p13, %p2664_p12 }
  0x1f   :  { %p2667_p1 = pnand %p2666_p0, %p2660_p11 }
  0x21   :  { %2670 = shalt.err (!%p2667_p1)
}
  0x22   :  { %s2703_s1 = smov 64   ;;  %s2704_s17 = smov 4  }
  0x23   :  { %40 = dma.hbm_to_vmem [thread:$0]  %s2806_s3, 4096, %s35_s8, [#allocation6], %s2703_s1, %s2703_s1, %s2704_s17  }
  0x24   :  { %2693 = dma.done.wait [#allocation3], 25088  }
  0x25   :  { %2694 = vsyncadd [#allocation3], 4294942208 }
  0x26   :  { %2695 = dma.done.wait [#allocation6], 4096  }
  0x27   :  { %2696 = vsyncadd [#allocation6], 4294963200  ;;  %v2294_v0 = vld [vmem:[#allocation2 + $0x4] ss:$16 sps:$4 sm:$0xff]   ;;  %v2296_v1 = vld [vmem:[#allocation2 + $0xc] ss:$16 sps:$4 sm:$0xff]  }
  0x28   :  { %1280 = vmatprep.subr.bf16.mxu0 %v2294_v0  ;;  %v2298_v2 = vld [vmem:[#allocation2] ss:$16 sps:$4 sm:$0xff]   ;;  %v2299_v3 = vld [vmem:[#allocation2 + $0x8] ss:$16 sps:$4 sm:$0xff]   ;;  %1444 = vmatprep.subr.bf16.mxu1 %v2296_v1  ;;  %v2300_v4 = vld [vmem:[#allocation2 + $0x24] ss:$16 sps:$4 sm:$0xff]  }
  0x29   :  { %1281 = vmatpush1.bf16.msra.mxu0 %v2298_v2  ;;  %1445 = vmatpush1.bf16.msra.mxu1 %v2299_v3  ;;  %v2302_v5 = vld [vmem:[#allocation2 + $0x2c] ss:$16 sps:$4 sm:$0xff]   ;;  %v2304_v6 = vld [vmem:[#allocation2 + $0x20] ss:$16 sps:$4 sm:$0xff]   ;;  %v2305_v7 = vld [vmem:[#allocation2 + $0x28] ss:$16 sps:$4 sm:$0xff]  }
  0x2a   :  { %1282 = vmatprep.subr.bf16.mxu0 %v2300_v4  ;;  %1446 = vmatprep.subr.bf16.mxu1 %v2302_v5  ;;  %v2306_v8 = vld [vmem:[#allocation2 + $0x44] ss:$16 sps:$4 sm:$0xff]   ;;  %v2308_v9 = vld [vmem:[#allocation2 + $0x4c] ss:$16 sps:$4 sm:$0xff]   ;;  %v2310_v10 = vld [vmem:[#allocation2 + $0x40] ss:$16 sps:$4 sm:$0xff]  }
  0x2b   :  { %v2311_v11 = vld [vmem:[#allocation2 + $0x48] ss:$16 sps:$4 sm:$0xff]   ;;  %v2312_v12 = vld [vmem:[#allocation2 + $0x64] ss:$16 sps:$4 sm:$0xff]   ;;  %v2314_v13 = vld [vmem:[#allocation2 + $0x6c] ss:$16 sps:$4 sm:$0xff]  }
  0x2c   :  { %v2316_v14 = vld [vmem:[#allocation2 + $0x60] ss:$16 sps:$4 sm:$0xff]   ;;  %v2317_v15 = vld [vmem:[#allocation2 + $0x68] ss:$16 sps:$4 sm:$0xff]   ;;  %v2318_v16 = vld [vmem:[#allocation2 + $0x84] ss:$16 sps:$4 sm:$0xff]  }
  0x2d   :  { %1283 = vmatpush1.bf16.msra.mxu0 %v2304_v6  ;;  %1447 = vmatpush1.bf16.msra.mxu1 %v2305_v7  ;;  %v2320_v17 = vld [vmem:[#allocation2 + $0x8c] ss:$16 sps:$4 sm:$0xff]   ;;  %v2322_v18 = vld [vmem:[#allocation2 + $0x80] ss:$16 sps:$4 sm:$0xff]   ;;  %v2323_v19 = vld [vmem:[#allocation2 + $0x88] ss:$16 sps:$4 sm:$0xff]  }
  0x2e   :  { %1284 = vmatprep.subr.bf16.mxu0 %v2306_v8  ;;  %1448 = vmatprep.subr.bf16.mxu1 %v2308_v9  ;;  %v2324_v20 = vld [vmem:[#allocation2 + $0xa4] ss:$16 sps:$4 sm:$0xff]   ;;  %v2326_v21 = vld [vmem:[#allocation2 + $0xac] ss:$16 sps:$4 sm:$0xff]   ;;  %v2328_v22 = vld [vmem:[#allocation2 + $0xa0] ss:$16 sps:$4 sm:$0xff]  }
  0x2f   :  { %v2329_v23 = vld [vmem:[#allocation2 + $0xa8] ss:$16 sps:$4 sm:$0xff]   ;;  %v2330_v24 = vld [vmem:[#allocation2 + $0xc4] ss:$16 sps:$4 sm:$0xff]   ;;  %v2332_v25 = vld [vmem:[#allocation2 + $0xcc] ss:$16 sps:$4 sm:$0xff]  }
  0x30   :  { %v2334_v26 = vld [vmem:[#allocation2 + $0xc0] ss:$16 sps:$4 sm:$0xff]   ;;  %v2335_v27 = vld [vmem:[#allocation2 + $0xc8] ss:$16 sps:$4 sm:$0xff]   ;;  %v2336_v28 = vld [vmem:[#allocation2 + $0xe4] ss:$16 sps:$4 sm:$0xff]  }
  0x31   :  { %1285 = vmatpush1.bf16.msra.mxu0 %v2310_v10  ;;  %1449 = vmatpush1.bf16.msra.mxu1 %v2311_v11  ;;  %v2338_v29 = vld [vmem:[#allocation2 + $0xec] ss:$16 sps:$4 sm:$0xff]   ;;  %v2340_v30 = vld [vmem:[#allocation2 + $0xe0] ss:$16 sps:$4 sm:$0xff]   ;;  %v2341_v31 = vld [vmem:[#allocation2 + $0xe8] ss:$16 sps:$4 sm:$0xff]  }
  0x32   :  { %1286 = vmatprep.subr.bf16.mxu0 %v2312_v12  ;;  %1450 = vmatprep.subr.bf16.mxu1 %v2314_v13  ;;  %v2342_v32 = vld [vmem:[#allocation2 + $0x104] ss:$16 sps:$4 sm:$0xff]   ;;  %v2344_v33 = vld [vmem:[#allocation2 + $0x10c] ss:$16 sps:$4 sm:$0xff]   ;;  %v2346_v34 = vld [vmem:[#allocation2 + $0x100] ss:$16 sps:$4 sm:$0xff]  }
  0x33   :  { %v2347_v35 = vld [vmem:[#allocation2 + $0x108] ss:$16 sps:$4 sm:$0xff]   ;;  %v2348_v36 = vld [vmem:[#allocation2 + $0x124] ss:$16 sps:$4 sm:$0xff]   ;;  %v2350_v37 = vld [vmem:[#allocation2 + $0x12c] ss:$16 sps:$4 sm:$0xff]  }
  0x34   :  { %v2352_v38 = vld [vmem:[#allocation2 + $0x120] ss:$16 sps:$4 sm:$0xff]   ;;  %v2353_v39 = vld [vmem:[#allocation2 + $0x128] ss:$16 sps:$4 sm:$0xff]   ;;  %v2354_v40 = vld [vmem:[#allocation2 + $0x144] ss:$16 sps:$4 sm:$0xff]  }
  0x35   :  { %1287 = vmatpush1.bf16.msra.mxu0 %v2316_v14  ;;  %1451 = vmatpush1.bf16.msra.mxu1 %v2317_v15  ;;  %v2356_v41 = vld [vmem:[#allocation2 + $0x14c] ss:$16 sps:$4 sm:$0xff]   ;;  %v2358_v42 = vld [vmem:[#allocation2 + $0x140] ss:$16 sps:$4 sm:$0xff]   ;;  %v2359_v43 = vld [vmem:[#allocation2 + $0x148] ss:$16 sps:$4 sm:$0xff]  }
  0x36   :  { %1288 = vmatprep.subr.bf16.mxu0 %v2318_v16  ;;  %1452 = vmatprep.subr.bf16.mxu1 %v2320_v17  ;;  %v2360_v44 = vld [vmem:[#allocation2 + $0x164] ss:$16 sps:$4 sm:$0xff]   ;;  %v2362_v45 = vld [vmem:[#allocation2 + $0x16c] ss:$16 sps:$4 sm:$0xff]   ;;  %v2364_v47 = vld [vmem:[#allocation2 + $0x160] ss:$16 sps:$4 sm:$0xff]  }
  0x37   :  { %v50_v46 = vld [vmem:[%s2803_s0] sm:$0xff]  ;;  %v2365_v49 = vld [vmem:[#allocation2 + $0x168] ss:$16 sps:$4 sm:$0xff]   ;;  %v2368_v51 = vld [vmem:[#allocation2 + $0x18c] ss:$16 sps:$4 sm:$0xff]   ;;  %vm1276_vm0 = vcmask 130048  }
  0x38   :  { %v1977_v48 = vcombine.high %v50_v46, %v50_v46  ;;  %v2366_v50 = vld [vmem:[#allocation2 + $0x184] ss:$16 sps:$4 sm:$0xff]   ;;  %v2370_v52 = vld [vmem:[#allocation2 + $0x180] ss:$16 sps:$4 sm:$0xff]   ;;  %v2371_v53 = vld [vmem:[#allocation2 + $0x188] ss:$16 sps:$4 sm:$0xff]   ;;  %v1976_v4 = vcombine.low %v50_v46, %v50_v46 }
  0x39   :  { %1289 = vmatpush1.bf16.msra.mxu0 %v2322_v18  ;;  %1453 = vmatpush1.bf16.msra.mxu1 %v2323_v19  ;;  %v2372_v54 = vld [vmem:[#allocation2 + $0x1a4] ss:$16 sps:$4 sm:$0xff]   ;;  %v2374_v55 = vld [vmem:[#allocation2 + $0x1ac] ss:$16 sps:$4 sm:$0xff]   ;;  %v2376_v56 = vld [vmem:[#allocation2 + $0x1a0] ss:$16 sps:$4 sm:$0xff]  }
  0x3a   :  { %1290 = vmatprep.subr.bf16.mxu0 %v2324_v20  ;;  %1454 = vmatprep.subr.bf16.mxu1 %v2326_v21  ;;  %v2377_v57 = vld [vmem:[#allocation2 + $0x1a8] ss:$16 sps:$4 sm:$0xff]   ;;  %v2378_v58 = vld [vmem:[#allocation2 + $0x1c4] ss:$16 sps:$4 sm:$0xff]   ;;  %v2380_v59 = vld [vmem:[#allocation2 + $0x1cc] ss:$16 sps:$4 sm:$0xff]  }
  0x3b   :  { %1312 = vmatprep.mubr.bf16.mxu0 %v1977_v48  ;;  %1476 = vmatprep.mubr.bf16.mxu1 %v1977_v48  ;;  %v2382_v60 = vld [vmem:[#allocation2 + $0x1c0] ss:$16 sps:$4 sm:$0xff]   ;;  %v2383_v61 = vld [vmem:[#allocation2 + $0x1c8] ss:$16 sps:$4 sm:$0xff]   ;;  %v2384_v62 = vld [vmem:[#allocation2 + $0x1e4] ss:$16 sps:$4 sm:$0xff]  }
  0x3c   :  { %v2386_v63 = vld [vmem:[#allocation2 + $0x1ec] ss:$16 sps:$4 sm:$0xff]   ;;  %v2388_v0 = vld [vmem:[#allocation2 + $0x1e0] ss:$16 sps:$4 sm:$0xff]   ;;  %v2389_v1 = vld [vmem:[#allocation2 + $0x1e8] ss:$16 sps:$4 sm:$0xff]  }
  0x3d   :  { %1291 = vmatpush1.bf16.msra.mxu0 %v2328_v22  ;;  %1455 = vmatpush1.bf16.msra.mxu1 %v2329_v23  ;;  %v2394_v2 = vld [vmem:[#allocation2 + $0x204] ss:$16 sps:$4 sm:$0xff]   ;;  %v2397_v3 = vld [vmem:[#allocation2 + $0x20c] ss:$16 sps:$4 sm:$0xff]   ;;  %v2392_v5 = vld [vmem:[#allocation2 + $0x200] ss:$16 sps:$4 sm:$0xff]  }
  0x3e   :  { %1292 = vmatprep.subr.bf16.mxu0 %v2330_v24  ;;  %1456 = vmatprep.subr.bf16.mxu1 %v2332_v25  ;;  %v2395_v6 = vld [vmem:[#allocation2 + $0x208] ss:$16 sps:$4 sm:$0xff]   ;;  %v2400_v7 = vld [vmem:[#allocation2 + $0x224] ss:$16 sps:$4 sm:$0xff]   ;;  %v2403_v8 = vld [vmem:[#allocation2 + $0x22c] ss:$16 sps:$4 sm:$0xff]  }
  0x3f   :  { %v2398_v9 = vld [vmem:[#allocation2 + $0x220] ss:$16 sps:$4 sm:$0xff]   ;;  %v2401_v10 = vld [vmem:[#allocation2 + $0x228] ss:$16 sps:$4 sm:$0xff]   ;;  %v2406_v11 = vld [vmem:[#allocation2 + $0x244] ss:$16 sps:$4 sm:$0xff]  }
  0x40   :  { %v2409_v12 = vld [vmem:[#allocation2 + $0x24c] ss:$16 sps:$4 sm:$0xff]   ;;  %v2404_v13 = vld [vmem:[#allocation2 + $0x240] ss:$16 sps:$4 sm:$0xff]   ;;  %v2407_v14 = vld [vmem:[#allocation2 + $0x248] ss:$16 sps:$4 sm:$0xff]  }
  0x41   :  { %1293 = vmatpush1.bf16.msra.mxu0 %v2334_v26  ;;  %1457 = vmatpush1.bf16.msra.mxu1 %v2335_v27  ;;  %v2412_v15 = vld [vmem:[#allocation2 + $0x264] ss:$16 sps:$4 sm:$0xff]   ;;  %v2415_v16 = vld [vmem:[#allocation2 + $0x26c] ss:$16 sps:$4 sm:$0xff]   ;;  %v2410_v17 = vld [vmem:[#allocation2 + $0x260] ss:$16 sps:$4 sm:$0xff]  }
  0x42   :  { %1294 = vmatprep.subr.bf16.mxu0 %v2336_v28  ;;  %1458 = vmatprep.subr.bf16.mxu1 %v2338_v29  ;;  %v2413_v18 = vld [vmem:[#allocation2 + $0x268] ss:$16 sps:$4 sm:$0xff]   ;;  %v2418_v19 = vld [vmem:[#allocation2 + $0x284] ss:$16 sps:$4 sm:$0xff]   ;;  %v2421_v20 = vld [vmem:[#allocation2 + $0x28c] ss:$16 sps:$4 sm:$0xff]  }
  0x43   :  { %v2416_v21 = vld [vmem:[#allocation2 + $0x280] ss:$16 sps:$4 sm:$0xff]   ;;  %v2419_v22 = vld [vmem:[#allocation2 + $0x288] ss:$16 sps:$4 sm:$0xff]   ;;  %v2424_v23 = vld [vmem:[#allocation2 + $0x2a4] ss:$16 sps:$4 sm:$0xff]  }
  0x44   :  { %v2427_v24 = vld [vmem:[#allocation2 + $0x2ac] ss:$16 sps:$4 sm:$0xff]   ;;  %v2422_v25 = vld [vmem:[#allocation2 + $0x2a0] ss:$16 sps:$4 sm:$0xff]   ;;  %v2425_v26 = vld [vmem:[#allocation2 + $0x2a8] ss:$16 sps:$4 sm:$0xff]  }
  0x45   :  { %1295 = vmatpush1.bf16.msra.mxu0 %v2340_v30  ;;  %1459 = vmatpush1.bf16.msra.mxu1 %v2341_v31  ;;  %v2430_v27 = vld [vmem:[#allocation2 + $0x2c4] ss:$16 sps:$4 sm:$0xff]   ;;  %v2433_v28 = vld [vmem:[#allocation2 + $0x2cc] ss:$16 sps:$4 sm:$0xff]   ;;  %v2428_v31 = vld [vmem:[#allocation2 + $0x2c0] ss:$16 sps:$4 sm:$0xff]  }
  0x46   :  { %1296 = vmatprep.subr.bf16.mxu0 %v2342_v32  ;;  %1460 = vmatprep.subr.bf16.mxu1 %v2344_v33  ;;  %v2767_v29 = vld [vmem:[%s2803_s0 + $0x8] sm:$0xff]  ;;  %v2436_v33 = vld [vmem:[#allocation2 + $0x2e4] ss:$16 sps:$4 sm:$0xff]   ;;  %s2706_s29 = smov [#allocation7]  }
  0x47   :  { %v1979_v30 = vcombine.high %v2767_v29, %v2767_v29  ;;  %v2431_v32 = vld [vmem:[#allocation2 + $0x2c8] ss:$16 sps:$4 sm:$0xff]   ;;  %v2457_v46 = vld [vmem:[#allocation2 + $0x34c] ss:$16 sps:$4 sm:$0xff]   ;;  %s1966_s30 = sshll.u32 %s2706_s29, 4  ;;  %s1967_s30 = int_to_ptr.vmem [resolvable:$true] %s1966_s30 }
  0x48   :  { %v2455_v48 = vld [vmem:[#allocation2 + $0x348] ss:$16 sps:$4 sm:$0xff]   ;;  %s2671_s6 = scalar_lea.vmem %s1967_s30, 128  ;;  %p2676_p3 = scmp.lt.s32.totalorder %s1967_s30, %s1967_s30 }
  0x49   :  { %1297 = vmatpush1.bf16.msra.mxu0 %v2346_v34  ;;  %1461 = vmatpush1.bf16.msra.mxu1 %v2347_v35  ;;  %v2439_v34 = vld [vmem:[#allocation2 + $0x2ec] ss:$16 sps:$4 sm:$0xff]   ;;  %v2434_v35 = vld [vmem:[#allocation2 + $0x2e0] ss:$16 sps:$4 sm:$0xff]   ;;  %p2672_p2 = scmp.ne.s32.totalorder %s1967_s30, %s2671_s6  ;;  %p2677_p4 = scmp.lt.s32.totalorder %s2671_s6, %s2671_s6 }
  0x4a   :  { %1298 = vmatprep.subr.bf16.mxu0 %v2348_v36  ;;  %1462 = vmatprep.subr.bf16.mxu1 %v2350_v37  ;;  %v2437_v36 = vld [vmem:[#allocation2 + $0x2e8] ss:$16 sps:$4 sm:$0xff]   ;;  %v2442_v37 = vld [vmem:[#allocation2 + $0x304] ss:$16 sps:$4 sm:$0xff]  }
  0x4b   :  { %p2678_p5 = por %p2677_p4, %p2676_p3 }
  0x4d   :  { %1299 = vmatpush1.bf16.msra.mxu0 %v2352_v38  ;;  %1463 = vmatpush1.bf16.msra.mxu1 %v2353_v39  ;;  %v2445_v38 = vld [vmem:[#allocation2 + $0x30c] ss:$16 sps:$4 sm:$0xff]   ;;  %v2440_v39 = vld [vmem:[#allocation2 + $0x300] ss:$16 sps:$4 sm:$0xff]   ;;  %p2679_p6 = pnand %p2678_p5, %p2672_p2 }
  0x4e   :  { %1300 = vmatprep.subr.bf16.mxu0 %v2354_v40  ;;  %1464 = vmatprep.subr.bf16.mxu1 %v2356_v41  ;;  %v2443_v40 = vld [vmem:[#allocation2 + $0x308] ss:$16 sps:$4 sm:$0xff]   ;;  %v2448_v41 = vld [vmem:[#allocation2 + $0x324] ss:$16 sps:$4 sm:$0xff]  }
  0x51   :  { %1301 = vmatpush1.bf16.msra.mxu0 %v2358_v42  ;;  %1465 = vmatpush1.bf16.msra.mxu1 %v2359_v43  ;;  %v2451_v42 = vld [vmem:[#allocation2 + $0x32c] ss:$16 sps:$4 sm:$0xff]   ;;  %v2446_v43 = vld [vmem:[#allocation2 + $0x320] ss:$16 sps:$4 sm:$0xff]  }
  0x52   :  { %1302 = vmatprep.subr.bf16.mxu0 %v2360_v44  ;;  %1466 = vmatprep.subr.bf16.mxu1 %v2362_v45  ;;  %v2449_v44 = vld [vmem:[#allocation2 + $0x328] ss:$16 sps:$4 sm:$0xff]   ;;  %v2454_v45 = vld [vmem:[#allocation2 + $0x344] ss:$16 sps:$4 sm:$0xff]  }
  0x55   :  { %1303 = vmatpush1.bf16.msra.mxu0 %v2364_v47  ;;  %1467 = vmatpush1.bf16.msra.mxu1 %v2365_v49  ;;  %v2452_v47 = vld [vmem:[#allocation2 + $0x340] ss:$16 sps:$4 sm:$0xff]   ;;  %v2460_v49 = vld [vmem:[#allocation2 + $0x364] ss:$16 sps:$4 sm:$0xff]  }
  0x56   :  { %1304 = vmatprep.subr.bf16.mxu0 %v2366_v50  ;;  %1468 = vmatprep.subr.bf16.mxu1 %v2368_v51  ;;  %v2463_v50 = vld [vmem:[#allocation2 + $0x36c] ss:$16 sps:$4 sm:$0xff]   ;;  %v2458_v51 = vld [vmem:[#allocation2 + $0x360] ss:$16 sps:$4 sm:$0xff]  }
  0x59   :  { %1305 = vmatpush1.bf16.msra.mxu0 %v2370_v52  ;;  %1469 = vmatpush1.bf16.msra.mxu1 %v2371_v53  ;;  %v2461_v52 = vld [vmem:[#allocation2 + $0x368] ss:$16 sps:$4 sm:$0xff]   ;;  %v2466_v53 = vld [vmem:[#allocation2 + $0x384] ss:$16 sps:$4 sm:$0xff]  }
  0x5a   :  { %1306 = vmatprep.subr.bf16.mxu0 %v2372_v54  ;;  %1470 = vmatprep.subr.bf16.mxu1 %v2374_v55  ;;  %v2469_v54 = vld [vmem:[#allocation2 + $0x38c] ss:$16 sps:$4 sm:$0xff]   ;;  %v2464_v55 = vld [vmem:[#allocation2 + $0x380] ss:$16 sps:$4 sm:$0xff]  }
  0x5d   :  { %1307 = vmatpush1.bf16.msra.mxu0 %v2376_v56  ;;  %1471 = vmatpush1.bf16.msra.mxu1 %v2377_v57  ;;  %v2467_v56 = vld [vmem:[#allocation2 + $0x388] ss:$16 sps:$4 sm:$0xff]   ;;  %v2472_v57 = vld [vmem:[#allocation2 + $0x3a4] ss:$16 sps:$4 sm:$0xff]  }
  0x5e   :  { %1308 = vmatprep.subr.bf16.mxu0 %v2378_v58  ;;  %1472 = vmatprep.subr.bf16.mxu1 %v2380_v59  ;;  %v2475_v58 = vld [vmem:[#allocation2 + $0x3ac] ss:$16 sps:$4 sm:$0xff]   ;;  %v2470_v59 = vld [vmem:[#allocation2 + $0x3a0] ss:$16 sps:$4 sm:$0xff]  }
  0x61   :  { %1309 = vmatpush1.bf16.msra.mxu0 %v2382_v60  ;;  %1473 = vmatpush1.bf16.msra.mxu1 %v2383_v61  ;;  %v2473_v60 = vld [vmem:[#allocation2 + $0x3a8] ss:$16 sps:$4 sm:$0xff]   ;;  %v2478_v61 = vld [vmem:[#allocation2 + $0x3c4] ss:$16 sps:$4 sm:$0xff]  }
  0x62   :  { %1310 = vmatprep.subr.bf16.mxu0 %v2384_v62  ;;  %1474 = vmatprep.subr.bf16.mxu1 %v2386_v63  ;;  %v2481_v62 = vld [vmem:[#allocation2 + $0x3cc] ss:$16 sps:$4 sm:$0xff]   ;;  %v2476_v63 = vld [vmem:[#allocation2 + $0x3c0] ss:$16 sps:$4 sm:$0xff]  }
  0x65   :  { %1311 = vmatpush1.bf16.msra.mxu0 %v2388_v0  ;;  %1475 = vmatpush1.bf16.msra.mxu1 %v2389_v1  ;;  %v2479_v0 = vld [vmem:[#allocation2 + $0x3c8] ss:$16 sps:$4 sm:$0xff]   ;;  %v2484_v1 = vld [vmem:[#allocation2 + $0x3e4] ss:$16 sps:$4 sm:$0xff]  }
  0x66   :  { %1321 = vmatprep.subr.bf16.mxu0 %v2394_v2  ;;  %1485 = vmatprep.subr.bf16.mxu1 %v2397_v3  ;;  %v2487_v2 = vld [vmem:[#allocation2 + $0x3ec] ss:$16 sps:$4 sm:$0xff]   ;;  %v2482_v3 = vld [vmem:[#allocation2 + $0x3e0] ss:$16 sps:$4 sm:$0xff]  }
  0x68   :  { %1313 = vmatmul.mubr.bf16.vlgmr.msra.gmra.mrb[0].mxu0 %v1976_v4  ;;  %1477 = vmatmul.mubr.bf16.vlgmr.msra.gmra.mrb[0].mxu1 %v1976_v4  ;;  %v2485_v4 = vld [vmem:[#allocation2 + $0x3e8] ss:$16 sps:$4 sm:$0xff]  }
  0x69   :  { %1322 = vmatpush1.bf16.msra.mxu0 %v2392_v5  ;;  %1486 = vmatpush1.bf16.msra.mxu1 %v2395_v6  ;;  %v2492_v5 = vld [vmem:[#allocation2 + $0x404] ss:$16 sps:$4 sm:$0xff]   ;;  %v2495_v6 = vld [vmem:[#allocation2 + $0x40c] ss:$16 sps:$4 sm:$0xff]  }
  0x6a   :  { %1323 = vmatprep.subr.bf16.mxu0 %v2400_v7  ;;  %1487 = vmatprep.subr.bf16.mxu1 %v2403_v8  ;;  %v1978_v7 = vcombine.low %v2767_v29, %v2767_v29  ;;  %v2490_v8 = vld [vmem:[#allocation2 + $0x400] ss:$16 sps:$4 sm:$0xff]   ;;  %v2525_v29 = vld [vmem:[#allocation2 + $0x4ac] ss:$16 sps:$4 sm:$0xff]  }
  0x6b   :  { %1353 = vmatprep.mubr.bf16.mxu0 %v1979_v30  ;;  %1517 = vmatprep.mubr.bf16.mxu1 %v1979_v30  ;;  %v2520_v30 = vld [vmem:[#allocation2 + $0x4a0] ss:$16 sps:$4 sm:$0xff]  }
  0x6d   :  { %1324 = vmatpush1.bf16.msra.mxu0 %v2398_v9  ;;  %1488 = vmatpush1.bf16.msra.mxu1 %v2401_v10  ;;  %v2493_v9 = vld [vmem:[#allocation2 + $0x408] ss:$16 sps:$4 sm:$0xff]   ;;  %v2498_v10 = vld [vmem:[#allocation2 + $0x424] ss:$16 sps:$4 sm:$0xff]  }
  0x6e   :  { %1325 = vmatprep.subr.bf16.mxu0 %v2406_v11  ;;  %1489 = vmatprep.subr.bf16.mxu1 %v2409_v12  ;;  %v2776_v11 = vld [vmem:[%s2803_s0 + $0x10] sm:$0xff]  ;;  %v2501_v12 = vld [vmem:[#allocation2 + $0x42c] ss:$16 sps:$4 sm:$0xff]  }
  0x71   :  { %1326 = vmatpush1.bf16.msra.mxu0 %v2404_v13  ;;  %1490 = vmatpush1.bf16.msra.mxu1 %v2407_v14  ;;  %v1981_v13 = vcombine.high %v2776_v11, %v2776_v11  ;;  %v2496_v14 = vld [vmem:[#allocation2 + $0x420] ss:$16 sps:$4 sm:$0xff]  }
  0x72   :  { %1327 = vmatprep.subr.bf16.mxu0 %v2412_v15  ;;  %1491 = vmatprep.subr.bf16.mxu1 %v2415_v16  ;;  %v2499_v15 = vld [vmem:[#allocation2 + $0x428] ss:$16 sps:$4 sm:$0xff]   ;;  %v2504_v16 = vld [vmem:[#allocation2 + $0x444] ss:$16 sps:$4 sm:$0xff]  }
  0x75   :  { %1328 = vmatpush1.bf16.msra.mxu0 %v2410_v17  ;;  %1492 = vmatpush1.bf16.msra.mxu1 %v2413_v18  ;;  %v2507_v17 = vld [vmem:[#allocation2 + $0x44c] ss:$16 sps:$4 sm:$0xff]   ;;  %v2502_v18 = vld [vmem:[#allocation2 + $0x440] ss:$16 sps:$4 sm:$0xff]  }
  0x76   :  { %1329 = vmatprep.subr.bf16.mxu0 %v2418_v19  ;;  %1493 = vmatprep.subr.bf16.mxu1 %v2421_v20  ;;  %v2505_v19 = vld [vmem:[#allocation2 + $0x448] ss:$16 sps:$4 sm:$0xff]   ;;  %v2510_v20 = vld [vmem:[#allocation2 + $0x464] ss:$16 sps:$4 sm:$0xff]  }
  0x79   :  { %1330 = vmatpush1.bf16.msra.mxu0 %v2416_v21  ;;  %1494 = vmatpush1.bf16.msra.mxu1 %v2419_v22  ;;  %v2513_v21 = vld [vmem:[#allocation2 + $0x46c] ss:$16 sps:$4 sm:$0xff]   ;;  %v2508_v22 = vld [vmem:[#allocation2 + $0x460] ss:$16 sps:$4 sm:$0xff]  }
  0x7a   :  { %1331 = vmatprep.subr.bf16.mxu0 %v2424_v23  ;;  %1495 = vmatprep.subr.bf16.mxu1 %v2427_v24  ;;  %v2511_v23 = vld [vmem:[#allocation2 + $0x468] ss:$16 sps:$4 sm:$0xff]   ;;  %v2516_v24 = vld [vmem:[#allocation2 + $0x484] ss:$16 sps:$4 sm:$0xff]  }
  0x7d   :  { %1332 = vmatpush1.bf16.msra.mxu0 %v2422_v25  ;;  %1496 = vmatpush1.bf16.msra.mxu1 %v2425_v26  ;;  %v2519_v25 = vld [vmem:[#allocation2 + $0x48c] ss:$16 sps:$4 sm:$0xff]   ;;  %v2514_v26 = vld [vmem:[#allocation2 + $0x480] ss:$16 sps:$4 sm:$0xff]  }
  0x7e   :  { %1333 = vmatprep.subr.bf16.mxu0 %v2430_v27  ;;  %1497 = vmatprep.subr.bf16.mxu1 %v2433_v28  ;;  %v2517_v27 = vld [vmem:[#allocation2 + $0x488] ss:$16 sps:$4 sm:$0xff]   ;;  %v2522_v28 = vld [vmem:[#allocation2 + $0x4a4] ss:$16 sps:$4 sm:$0xff]  }
  0x81   :  { %1334 = vmatpush1.bf16.msra.mxu0 %v2428_v31  ;;  %1498 = vmatpush1.bf16.msra.mxu1 %v2431_v32  ;;  %v2523_v31 = vld [vmem:[#allocation2 + $0x4a8] ss:$16 sps:$4 sm:$0xff]   ;;  %v2528_v32 = vld [vmem:[#allocation2 + $0x4c4] ss:$16 sps:$4 sm:$0xff]  }
  0x82   :  { %1335 = vmatprep.subr.bf16.mxu0 %v2436_v33  ;;  %1499 = vmatprep.subr.bf16.mxu1 %v2439_v34  ;;  %v2531_v33 = vld [vmem:[#allocation2 + $0x4cc] ss:$16 sps:$4 sm:$0xff]   ;;  %v2526_v34 = vld [vmem:[#allocation2 + $0x4c0] ss:$16 sps:$4 sm:$0xff]  }
  0x85   :  { %1336 = vmatpush1.bf16.msra.mxu0 %v2434_v35  ;;  %1500 = vmatpush1.bf16.msra.mxu1 %v2437_v36  ;;  %v2529_v35 = vld [vmem:[#allocation2 + $0x4c8] ss:$16 sps:$4 sm:$0xff]   ;;  %v2534_v36 = vld [vmem:[#allocation2 + $0x4e4] ss:$16 sps:$4 sm:$0xff]  }
  0x86   :  { %1337 = vmatprep.subr.bf16.mxu0 %v2442_v37  ;;  %1501 = vmatprep.subr.bf16.mxu1 %v2445_v38  ;;  %v2537_v37 = vld [vmem:[#allocation2 + $0x4ec] ss:$16 sps:$4 sm:$0xff]   ;;  %v2532_v38 = vld [vmem:[#allocation2 + $0x4e0] ss:$16 sps:$4 sm:$0xff]  }
  0x89   :  { %1338 = vmatpush1.bf16.msra.mxu0 %v2440_v39  ;;  %1502 = vmatpush1.bf16.msra.mxu1 %v2443_v40  ;;  %v2535_v39 = vld [vmem:[#allocation2 + $0x4e8] ss:$16 sps:$4 sm:$0xff]   ;;  %v2540_v40 = vld [vmem:[#allocation2 + $0x504] ss:$16 sps:$4 sm:$0xff]  }
  0x8a   :  { %1339 = vmatprep.subr.bf16.mxu0 %v2448_v41  ;;  %1503 = vmatprep.subr.bf16.mxu1 %v2451_v42  ;;  %v2543_v41 = vld [vmem:[#allocation2 + $0x50c] ss:$16 sps:$4 sm:$0xff]   ;;  %v2538_v42 = vld [vmem:[#allocation2 + $0x500] ss:$16 sps:$4 sm:$0xff]  }
  0x8d   :  { %1340 = vmatpush1.bf16.msra.mxu0 %v2446_v43  ;;  %1504 = vmatpush1.bf16.msra.mxu1 %v2449_v44  ;;  %v2541_v43 = vld [vmem:[#allocation2 + $0x508] ss:$16 sps:$4 sm:$0xff]   ;;  %v2546_v44 = vld [vmem:[#allocation2 + $0x524] ss:$16 sps:$4 sm:$0xff]  }
  0x8e   :  { %1341 = vmatprep.subr.bf16.mxu0 %v2454_v45  ;;  %1505 = vmatprep.subr.bf16.mxu1 %v2457_v46  ;;  %v2549_v45 = vld [vmem:[#allocation2 + $0x52c] ss:$16 sps:$4 sm:$0xff]   ;;  %v2544_v46 = vld [vmem:[#allocation2 + $0x520] ss:$16 sps:$4 sm:$0xff]  }
  0x91   :  { %1342 = vmatpush1.bf16.msra.mxu0 %v2452_v47  ;;  %1506 = vmatpush1.bf16.msra.mxu1 %v2455_v48  ;;  %v2547_v47 = vld [vmem:[#allocation2 + $0x528] ss:$16 sps:$4 sm:$0xff]   ;;  %v2552_v48 = vld [vmem:[#allocation2 + $0x544] ss:$16 sps:$4 sm:$0xff]  }
  0x92   :  { %1343 = vmatprep.subr.bf16.mxu0 %v2460_v49  ;;  %1507 = vmatprep.subr.bf16.mxu1 %v2463_v50  ;;  %v2555_v49 = vld [vmem:[#allocation2 + $0x54c] ss:$16 sps:$4 sm:$0xff]   ;;  %v2550_v50 = vld [vmem:[#allocation2 + $0x540] ss:$16 sps:$4 sm:$0xff]  }
  0x95   :  { %1344 = vmatpush1.bf16.msra.mxu0 %v2458_v51  ;;  %1508 = vmatpush1.bf16.msra.mxu1 %v2461_v52  ;;  %v2553_v51 = vld [vmem:[#allocation2 + $0x548] ss:$16 sps:$4 sm:$0xff]   ;;  %v2558_v52 = vld [vmem:[#allocation2 + $0x564] ss:$16 sps:$4 sm:$0xff]  }
  0x96   :  { %1345 = vmatprep.subr.bf16.mxu0 %v2466_v53  ;;  %1509 = vmatprep.subr.bf16.mxu1 %v2469_v54  ;;  %v2561_v53 = vld [vmem:[#allocation2 + $0x56c] ss:$16 sps:$4 sm:$0xff]   ;;  %v2556_v54 = vld [vmem:[#allocation2 + $0x560] ss:$16 sps:$4 sm:$0xff]  }
  0x99   :  { %1346 = vmatpush1.bf16.msra.mxu0 %v2464_v55  ;;  %1510 = vmatpush1.bf16.msra.mxu1 %v2467_v56  ;;  %v2559_v55 = vld [vmem:[#allocation2 + $0x568] ss:$16 sps:$4 sm:$0xff]   ;;  %v2564_v56 = vld [vmem:[#allocation2 + $0x584] ss:$16 sps:$4 sm:$0xff]  }
  0x9a   :  { %1347 = vmatprep.subr.bf16.mxu0 %v2472_v57  ;;  %1511 = vmatprep.subr.bf16.mxu1 %v2475_v58  ;;  %v2567_v57 = vld [vmem:[#allocation2 + $0x58c] ss:$16 sps:$4 sm:$0xff]   ;;  %v2562_v58 = vld [vmem:[#allocation2 + $0x580] ss:$16 sps:$4 sm:$0xff]  }
  0x9d   :  { %1348 = vmatpush1.bf16.msra.mxu0 %v2470_v59  ;;  %1512 = vmatpush1.bf16.msra.mxu1 %v2473_v60  ;;  %v2565_v59 = vld [vmem:[#allocation2 + $0x588] ss:$16 sps:$4 sm:$0xff]   ;;  %v2570_v60 = vld [vmem:[#allocation2 + $0x5a4] ss:$16 sps:$4 sm:$0xff]  }
  0x9e   :  { %1349 = vmatprep.subr.bf16.mxu0 %v2478_v61  ;;  %1513 = vmatprep.subr.bf16.mxu1 %v2481_v62  ;;  %v2573_v61 = vld [vmem:[#allocation2 + $0x5ac] ss:$16 sps:$4 sm:$0xff]   ;;  %v2568_v62 = vld [vmem:[#allocation2 + $0x5a0] ss:$16 sps:$4 sm:$0xff]  }
  0xa1   :  { %1350 = vmatpush1.bf16.msra.mxu0 %v2476_v63  ;;  %1514 = vmatpush1.bf16.msra.mxu1 %v2479_v0  ;;  %v2571_v63 = vld [vmem:[#allocation2 + $0x5a8] ss:$16 sps:$4 sm:$0xff]   ;;  %v2576_v0 = vld [vmem:[#allocation2 + $0x5c4] ss:$16 sps:$4 sm:$0xff]  }
  0xa2   :  { %1351 = vmatprep.subr.bf16.mxu0 %v2484_v1  ;;  %1515 = vmatprep.subr.bf16.mxu1 %v2487_v2  ;;  %v2579_v1 = vld [vmem:[#allocation2 + $0x5cc] ss:$16 sps:$4 sm:$0xff]   ;;  %v2574_v2 = vld [vmem:[#allocation2 + $0x5c0] ss:$16 sps:$4 sm:$0xff]  }
  0xa5   :  { %1352 = vmatpush1.bf16.msra.mxu0 %v2482_v3  ;;  %1516 = vmatpush1.bf16.msra.mxu1 %v2485_v4  ;;  %v2577_v3 = vld [vmem:[#allocation2 + $0x5c8] ss:$16 sps:$4 sm:$0xff]   ;;  %v2582_v4 = vld [vmem:[#allocation2 + $0x5e4] ss:$16 sps:$4 sm:$0xff]  }
  0xa6   :  { %1362 = vmatprep.subr.bf16.mxu0 %v2492_v5  ;;  %1526 = vmatprep.subr.bf16.mxu1 %v2495_v6  ;;  %v2585_v5 = vld [vmem:[#allocation2 + $0x5ec] ss:$16 sps:$4 sm:$0xff]   ;;  %v2580_v6 = vld [vmem:[#allocation2 + $0x5e0] ss:$16 sps:$4 sm:$0xff]  }
  0xa8   :  { %1354 = vmatmul.mubr.bf16.vlgmr.msra.gmra.mrb[0].mxu0 %v1978_v7  ;;  %1518 = vmatmul.mubr.bf16.vlgmr.msra.gmra.mrb[0].mxu1 %v1978_v7  ;;  %v2583_v7 = vld [vmem:[#allocation2 + $0x5e8] ss:$16 sps:$4 sm:$0xff]  }
  0xa9   :  { %1363 = vmatpush1.bf16.msra.mxu0 %v2490_v8  ;;  %1527 = vmatpush1.bf16.msra.mxu1 %v2493_v9  ;;  %v2590_v8 = vld [vmem:[#allocation2 + $0x604] ss:$16 sps:$4 sm:$0xff]   ;;  %v2593_v9 = vld [vmem:[#allocation2 + $0x60c] ss:$16 sps:$4 sm:$0xff]  }
  0xaa   :  { %1364 = vmatprep.subr.bf16.mxu0 %v2498_v10  ;;  %1528 = vmatprep.subr.bf16.mxu1 %v2501_v12  ;;  %v1980_v10 = vcombine.low %v2776_v11, %v2776_v11  ;;  %v2588_v12 = vld [vmem:[#allocation2 + $0x600] ss:$16 sps:$4 sm:$0xff]   ;;  %v2594_v11 = vld [vmem:[%s2803_s0 + $0x18] ss:$0 sps:$4 sm:$0xff]  }
  0xab   :  { %1394 = vmatprep.mubr.bf16.mxu0 %v1981_v13  ;;  %1558 = vmatprep.mubr.bf16.mxu1 %v1981_v13  ;;  %v2591_v13 = vld [vmem:[#allocation2 + $0x608] ss:$16 sps:$4 sm:$0xff]  }
  0xad   :  { %1365 = vmatpush1.bf16.msra.mxu0 %v2496_v14  ;;  %1529 = vmatpush1.bf16.msra.mxu1 %v2499_v15  ;;  %v2595_v14 = vld [vmem:[#allocation5 + $0x40] sm:$0xff]  }
  0xae   :  { %1366 = vmatprep.subr.bf16.mxu0 %v2504_v16  ;;  %1530 = vmatprep.subr.bf16.mxu1 %v2507_v17  ;;  %v2596_v15 = vld [vmem:[#allocation5 + $0xc0] sm:$0xff]   ;;  %v2705_v16 = vmov 0  }
  0xaf   :  { %v2597_v17 = vld [vmem:[#allocation5] sm:$0xff]  }
  0xb1   :  { %1367 = vmatpush1.bf16.msra.mxu0 %v2502_v18  ;;  %1531 = vmatpush1.bf16.msra.mxu1 %v2505_v19  ;;  %v2598_v18 = vld [vmem:[#allocation5 + $0x80] sm:$0xff]   ;;  %v2599_v19 = vld [vmem:[#allocation5 + $0x48] sm:$0xff]  }
  0xb2   :  { %1368 = vmatprep.subr.bf16.mxu0 %v2510_v20  ;;  %1532 = vmatprep.subr.bf16.mxu1 %v2513_v21  ;;  %v2600_v20 = vld [vmem:[#allocation5 + $0xc8] sm:$0xff]  }
  0xb3   :  { %v2601_v21 = vld [vmem:[#allocation5 + $0x8] sm:$0xff]  }
  0xb5   :  { %1369 = vmatpush1.bf16.msra.mxu0 %v2508_v22  ;;  %1533 = vmatpush1.bf16.msra.mxu1 %v2511_v23  ;;  %v2602_v22 = vld [vmem:[#allocation5 + $0x88] sm:$0xff]   ;;  %v2603_v23 = vld [vmem:[#allocation5 + $0x50] sm:$0xff]  }
  0xb6   :  { %1370 = vmatprep.subr.bf16.mxu0 %v2516_v24  ;;  %1534 = vmatprep.subr.bf16.mxu1 %v2519_v25  ;;  %v2604_v24 = vld [vmem:[#allocation5 + $0xd0] sm:$0xff]  }
  0xb7   :  { %v2605_v25 = vld [vmem:[#allocation5 + $0x10] sm:$0xff]  }
  0xb9   :  { %1371 = vmatpush1.bf16.msra.mxu0 %v2514_v26  ;;  %1535 = vmatpush1.bf16.msra.mxu1 %v2517_v27  ;;  %v2606_v26 = vld [vmem:[#allocation5 + $0x90] sm:$0xff]   ;;  %v2607_v27 = vld [vmem:[#allocation5 + $0x58] sm:$0xff]  }
  0xba   :  { %1372 = vmatprep.subr.bf16.mxu0 %v2522_v28  ;;  %1536 = vmatprep.subr.bf16.mxu1 %v2525_v29  ;;  %v2608_v28 = vld [vmem:[#allocation5 + $0xd8] sm:$0xff]  }
  0xbb   :  { %v2609_v29 = vld [vmem:[#allocation5 + $0x18] sm:$0xff]  }
  0xbd   :  { %1373 = vmatpush1.bf16.msra.mxu0 %v2520_v30  ;;  %1537 = vmatpush1.bf16.msra.mxu1 %v2523_v31  ;;  %v2610_v30 = vld [vmem:[#allocation5 + $0x98] sm:$0xff]   ;;  %v2611_v31 = vld [vmem:[#allocation5 + $0x60] sm:$0xff]  }
  0xbe   :  { %1374 = vmatprep.subr.bf16.mxu0 %v2528_v32  ;;  %1538 = vmatprep.subr.bf16.mxu1 %v2531_v33  ;;  %v2612_v32 = vld [vmem:[#allocation5 + $0xe0] sm:$0xff]  }
  0xbf   :  { %v2613_v33 = vld [vmem:[#allocation5 + $0x20] sm:$0xff]  }
  0xc1   :  { %1375 = vmatpush1.bf16.msra.mxu0 %v2526_v34  ;;  %1539 = vmatpush1.bf16.msra.mxu1 %v2529_v35  ;;  %v2614_v34 = vld [vmem:[#allocation5 + $0xa0] sm:$0xff]   ;;  %v2615_v35 = vld [vmem:[#allocation5 + $0x68] sm:$0xff]  }
  0xc2   :  { %1376 = vmatprep.subr.bf16.mxu0 %v2534_v36  ;;  %1540 = vmatprep.subr.bf16.mxu1 %v2537_v37  ;;  %v2616_v36 = vld [vmem:[#allocation5 + $0xe8] sm:$0xff]  }
  0xc3   :  { %v2617_v37 = vld [vmem:[#allocation5 + $0x28] sm:$0xff]  }
  0xc5   :  { %1377 = vmatpush1.bf16.msra.mxu0 %v2532_v38  ;;  %1541 = vmatpush1.bf16.msra.mxu1 %v2535_v39  ;;  %v2618_v38 = vld [vmem:[#allocation5 + $0xa8] sm:$0xff]   ;;  %v2619_v39 = vld [vmem:[#allocation5 + $0x70] sm:$0xff]  }
  0xc6   :  { %1378 = vmatprep.subr.bf16.mxu0 %v2540_v40  ;;  %1542 = vmatprep.subr.bf16.mxu1 %v2543_v41  ;;  %v2620_v40 = vld [vmem:[#allocation5 + $0xf0] sm:$0xff]  }
  0xc7   :  { %v2621_v41 = vld [vmem:[#allocation5 + $0x30] sm:$0xff]  }
  0xc9   :  { %1379 = vmatpush1.bf16.msra.mxu0 %v2538_v42  ;;  %1543 = vmatpush1.bf16.msra.mxu1 %v2541_v43  ;;  %v2622_v42 = vld [vmem:[#allocation5 + $0xb0] sm:$0xff]   ;;  %v2623_v43 = vld [vmem:[#allocation5 + $0x78] sm:$0xff]  }
  0xca   :  { %1380 = vmatprep.subr.bf16.mxu0 %v2546_v44  ;;  %1544 = vmatprep.subr.bf16.mxu1 %v2549_v45  ;;  %v2624_v44 = vld [vmem:[#allocation5 + $0xf8] sm:$0xff]  }
  0xcb   :  { %v2625_v45 = vld [vmem:[#allocation5 + $0x38] sm:$0xff]  }
  0xcd   :  { %1381 = vmatpush1.bf16.msra.mxu0 %v2544_v46  ;;  %1545 = vmatpush1.bf16.msra.mxu1 %v2547_v47  ;;  %v2626_v46 = vld [vmem:[#allocation5 + $0xb8] sm:$0xff]   ;;  %v252_v47 = vlaneseq }
  0xce   :  { %1382 = vmatprep.subr.bf16.mxu0 %v2552_v48  ;;  %1546 = vmatprep.subr.bf16.mxu1 %v2555_v49 }
  0xcf   :  { %v253_v48 = vshrl.u32 %v252_v47, 7 }
  0xd1   :  { %1383 = vmatpush1.bf16.msra.mxu0 %v2550_v50  ;;  %1547 = vmatpush1.bf16.msra.mxu1 %v2553_v51  ;;  %v254_v49 = vsub.s32 0, %v253_v48  ;;  %v262_v50 = vsub.s32 2, %v253_v48  ;;  %v250_v51 = vld [vmem:[%s2805_s2] sm:$0xf] }
  0xd2   :  { %1384 = vmatprep.subr.bf16.mxu0 %v2558_v52  ;;  %1548 = vmatprep.subr.bf16.mxu1 %v2561_v53  ;;  %v258_v52 = vsub.s32 1, %v253_v48  ;;  %v266_v53 = vsub.s32 3, %v253_v48 }
  0xd5   :  { %1385 = vmatpush1.bf16.msra.mxu0 %v2556_v54  ;;  %1549 = vmatpush1.bf16.msra.mxu1 %v2559_v55  ;;  %v255_v54 = vrot.slane %v250_v51, %v254_v49  ;;  %v263_v55 = vrot.slane %v250_v51, %v262_v50 }
  0xd6   :  { %1386 = vmatprep.subr.bf16.mxu0 %v2564_v56  ;;  %1550 = vmatprep.subr.bf16.mxu1 %v2567_v57  ;;  %v259_v56 = vrot.slane %v250_v51, %v258_v52  ;;  %v267_v57 = vrot.slane %v250_v51, %v266_v53 }
  0xd9   :  { %1387 = vmatpush1.bf16.msra.mxu0 %v2562_v58  ;;  %1551 = vmatpush1.bf16.msra.mxu1 %v2565_v59 }
  0xda   :  { %1388 = vmatprep.subr.bf16.mxu0 %v2570_v60  ;;  %1552 = vmatprep.subr.bf16.mxu1 %v2573_v61 }
  0xdd   :  { %1389 = vmatpush1.bf16.msra.mxu0 %v2568_v62  ;;  %1553 = vmatpush1.bf16.msra.mxu1 %v2571_v63 }
  0xde   :  { %1390 = vmatprep.subr.bf16.mxu0 %v2576_v0  ;;  %1554 = vmatprep.subr.bf16.mxu1 %v2579_v1 }
  0xe1   :  { %1391 = vmatpush1.bf16.msra.mxu0 %v2574_v2  ;;  %1555 = vmatpush1.bf16.msra.mxu1 %v2577_v3 }
  0xe2   :  { %1392 = vmatprep.subr.bf16.mxu0 %v2582_v4  ;;  %1556 = vmatprep.subr.bf16.mxu1 %v2585_v5 }
  0xe5   :  { %1393 = vmatpush1.bf16.msra.mxu0 %v2580_v6  ;;  %1557 = vmatpush1.bf16.msra.mxu1 %v2583_v7 }
  0xe6   :  { %1403 = vmatprep.subr.bf16.mxu0 %v2590_v8  ;;  %1567 = vmatprep.subr.bf16.mxu1 %v2593_v9 }
  0xe8   :  { %1395 = vmatmul.mubr.bf16.vlgmr.msra.gmra.mrb[0].mxu0 %v1980_v10  ;;  %1559 = vmatmul.mubr.bf16.vlgmr.msra.gmra.mrb[0].mxu1 %v1980_v10 }
  0xe9   :  { %1404 = vmatpush1.bf16.msra.mxu0 %v2588_v12  ;;  %1568 = vmatpush1.bf16.msra.mxu1 %v2591_v13 }
  0xea   :  { %1435 = vmatprep.mubr.bf16.mxu0 %v2705_v16  ;;  %1599 = vmatprep.mubr.bf16.mxu1 %v2705_v16 }
  0xeb   :  { %2214 = vmatprep.subr.bf16.mxu0 %v2595_v14  ;;  %2236 = vmatprep.subr.bf16.mxu1 %v2596_v15 }
  0xf4   :  { %2179 = vmatmul.mubr.msk.bf16.vlgmr.msra.gmra.mrb[0].mxu0 %vm1276_vm0, %v2594_v11  ;;  %2180 = vmatmul.mubr.msk.bf16.vlgmr.msra.gmra.mrb[0].mxu1 %vm1276_vm0, %v2594_v11  ;;  %v2181_v11 = vld [vmem:[%s2807_s4] ss:$0 sm:$0xff] }
  0xf5   :  { %2215 = vmatpush3.bf16.msra.mxu0 %v2597_v17  ;;  %2237 = vmatpush3.bf16.msra.mxu1 %v2598_v18 }
  0xf6   :  { %2216 = vmatprep.subr.bf16.mxu0 %v2599_v19  ;;  %2238 = vmatprep.subr.bf16.mxu1 %v2600_v20 }
  0xf9   :  { %2217 = vmatpush3.bf16.msra.mxu0 %v2601_v21  ;;  %2239 = vmatpush3.bf16.msra.mxu1 %v2602_v22 }
  0xfa   :  { %2218 = vmatprep.subr.bf16.mxu0 %v2603_v23  ;;  %2240 = vmatprep.subr.bf16.mxu1 %v2604_v24 }
  0xfd   :  { %2219 = vmatpush3.bf16.msra.mxu0 %v2605_v25  ;;  %2241 = vmatpush3.bf16.msra.mxu1 %v2606_v26 }
  0xfe   :  { %2220 = vmatprep.subr.bf16.mxu0 %v2607_v27  ;;  %2242 = vmatprep.subr.bf16.mxu1 %v2608_v28 }
 0x101   :  { %2221 = vmatpush3.bf16.msra.mxu0 %v2609_v29  ;;  %2243 = vmatpush3.bf16.msra.mxu1 %v2610_v30 }
 0x102   :  { %2222 = vmatprep.subr.bf16.mxu0 %v2611_v31  ;;  %2244 = vmatprep.subr.bf16.mxu1 %v2612_v32 }
 0x105   :  { %2223 = vmatpush3.bf16.msra.mxu0 %v2613_v33  ;;  %2245 = vmatpush3.bf16.msra.mxu1 %v2614_v34 }
 0x106   :  { %2224 = vmatprep.subr.bf16.mxu0 %v2615_v35  ;;  %2246 = vmatprep.subr.bf16.mxu1 %v2616_v36 }
 0x109   :  { %2225 = vmatpush3.bf16.msra.mxu0 %v2617_v37  ;;  %2247 = vmatpush3.bf16.msra.mxu1 %v2618_v38 }
 0x10a   :  { %2226 = vmatprep.subr.bf16.mxu0 %v2619_v39  ;;  %2248 = vmatprep.subr.bf16.mxu1 %v2620_v40 }
 0x10d   :  { %2227 = vmatpush3.bf16.msra.mxu0 %v2621_v41  ;;  %2249 = vmatpush3.bf16.msra.mxu1 %v2622_v42 }
 0x10e   :  { %2228 = vmatprep.subr.bf16.mxu0 %v2623_v43  ;;  %2250 = vmatprep.subr.bf16.mxu1 %v2624_v44 }
 0x111   :  { %2229 = vmatpush3.bf16.msra.mxu0 %v2625_v45  ;;  %2251 = vmatpush3.bf16.msra.mxu1 %v2626_v46 }
 0x1c7   :  { %v1437_v58 = vpop.f32.mrb[0].mxu0  ;;  %v1601_v59 = vpop.f32.mrb[0].mxu1 }
 0x1c8   :  { %v2258_v60 = vadd.f32 %v1437_v58, %v255_v54  ;;  %v2260_v61 = vadd.f32 %v1601_v59, %v263_v55  ;;  %v1439_v62 = vpop.f32.mrb[1].mxu0  ;;  %v1603_v63 = vpop.f32.mrb[1].mxu1 }
 0x1c9   :  { %v2259_v0 = vadd.f32 %v1439_v62, %v259_v56  ;;  %v2261_v1 = vadd.f32 %v1603_v63, %v267_v57  ;;  %v1441_v2 = vpop.f32.mrb[2].mxu0  ;;  %v1605_v3 = vpop.f32.mrb[2].mxu1 }
 0x1ca   :  { %v1608_v4 = vmax.f32 %v2258_v60, 0.0  ;;  %v1610_v5 = vmax.f32 %v2260_v61, 0.0  ;;  %v1442_v6 = vpop.f32.mrb[3].mxu0  ;;  %v1606_v7 = vpop.f32.mrb[3].mxu1 }
 0x1cb   :  { %v1609_v8 = vmax.f32 %v2259_v0, 0.0  ;;  %v1611_v9 = vmax.f32 %v2261_v1, 0.0 }
 0x1cc   :  { %v1612_v13 = vpack.c.bf16 %v1608_v4, %v1608_v4  ;;  %v1614_v14 = vpack.c.bf16 %v1610_v5, %v1610_v5 }
 0x1cd   :  { %v1613_v10 = vpack.c.bf16 %v1609_v8, %v1609_v8  ;;  %v1615_v12 = vpack.c.bf16 %v1611_v9, %v1611_v9 }
 0x1cf   :  { %1911 = vmatprep.mubr.bf16.mxu0 %v1613_v10  ;;  %1951 = vmatprep.mubr.bf16.mxu1 %v1615_v12 }
 0x1d0   :  { %1912 = vmatmul.mubr.bf16.vlgmr.msra.gmra.mrb[4].mxu0 %v1612_v13  ;;  %1952 = vmatmul.mubr.bf16.vlgmr.msra.gmra.mrb[4].mxu1 %v1614_v14 }
 0x2a3   :  { %v2230_v15 = vpop.f32.mrb[4].mxu0  ;;  %v2252_v16 = vpop.f32.mrb[4].mxu1 }
 0x2a4   :  { %v2231_v17 = vpop.f32.mrb[5].mxu0  ;;  %v2253_v18 = vpop.f32.mrb[5].mxu1 }
 0x2a5   :  { %v2232_v19 = vadd.f32 %v2231_v17, %v2230_v15  ;;  %v2254_v20 = vadd.f32 %v2253_v18, %v2252_v16  ;;  %v2233_v21 = vpop.f32.mrb[6].mxu0  ;;  %v2255_v22 = vpop.f32.mrb[6].mxu1 }
 0x2a6   :  { %v2234_v23 = vpop.f32.mrb[7].mxu0  ;;  %v2256_v24 = vpop.f32.mrb[7].mxu1 }
 0x2a7   :  { %v1914_v25 = vadd.f32 %v2232_v19, %v2181_v11 }
 0x2a9   :  { %v1954_v26 = vadd.f32 %v2254_v20, %v1914_v25 }
 0x2ab   :  { %1959 = vst [vmem:[#allocation7] sm:$0xff] %v1954_v26 }
 0x2ac   :  { %2682 = shalt.err (!%p2679_p6)
}
 0x2ad   :  { %s2683_s8 = scalar_lea.hbm %s2808_s5, 128 }
 0x2ae   :  { %p2684_p7 = scmp.ne.s32.totalorder %s2808_s5, %s2683_s8  ;;  %p2687_p8 = scmp.lt.u32.totalorder %s2683_s8, %s2808_s5 }
 0x2b0   :  { %p2689_p9 = pnand %p2687_p8, %p2684_p7 }
 0x2b2   :  { %2692 = shalt.err (!%p2689_p9)
}
 0x2b3   :  { %1969 = dma.vmem_to_hbm [thread:$0]  %s1967_s30, 128, %s2808_s5, [#allocation4]  }
 0x2b4   :  { %2697 = dma.done.wait [#allocation4], 128  }
 0x2b5   :  { %2698 = vsyncadd [#allocation4], 4294967168 }
 0x2b6   :  { %1973 = vsyncpa [#allocation3], 1 }
 0x2b7   :  { %1974 = vsyncpa [#allocation6], 1 }
 0x2b8   :  { %1975 = vsyncpa [#allocation4], 1 }

</bundles_post_ra>
